<compile_context>
chip_gen: v5e
topology: v5e:2x2
jax: 0.10.0
libtpu: 0.0.40
codegen_flags: <defaults>
</compile_context>

<pallas_src>
import numpy as np
import jax
import jax.numpy as jnp
from jax.experimental import pallas as pl
from jax.experimental.pallas import tpu as pltpu


def _round_up(x, k):
    return ((x + k - 1) // k) * k


def _soft_thr(z, thr):
    # sign(z) * max(|z| - thr, 0)  ==  z - clip(z, -thr, thr)   (requires thr >= 0)
    return z - jnp.clip(z, -thr, thr)


def alista_kernel(thr_ref, step_ref, c_ref, M_ref, x_out_ref, d_ref):
    """One (batch-tile, iteration-chunk) grid step.

    thr_ref, step_ref : (padded_iter,) f32 in SMEM (whole array every step)
    c_ref             : (TB, Np)            f32 in VMEM  (y @ W tile, zero-padded)
    M_ref             : (Np, Np)       f32/bf16 in VMEM  (A.T @ W, broadcast)
    x_out_ref         : (iter_chunk, TB, Np) f32 VMEM output block
    d_ref             : (TB, Np) f32 VMEM scratch; carries d across iteration chunks
    """
    ic = pl.program_id(1)
    iter_chunk = x_out_ref.shape[0]

    # New batch tile -> reset carried state d to zero.
    @pl.when(ic == 0)
    def _():
        d_ref[...] = jnp.zeros_like(d_ref)

    c = c_ref[...]
    d = d_ref[...]
    t0 = ic * iter_chunk

    # Short static unroll (<= 8) per chunk; the "arbitrary" chunk grid axis
    # bounds code size and vreg live ranges for large numIter.
    for j in range(iter_chunk):
        t = t0 + j
        # Fused gradient: (d @ A.T - y) @ W == d @ M - c.  Re-read M from VMEM
        # each iteration (vld is cheap) rather than pinning Np^2/1024 vregs.
        grad = jnp.dot(d.astype(M_ref.dtype), M_ref[...],
                       preferred_element_type=jnp.float32) - c
        z = d - step_ref[t] * grad
        d = _soft_thr(z, thr_ref[t])
        x_out_ref[j, :, :] = d

    d_ref[...] = d  # carry into the next iteration chunk


def precompute_alista_operator(A, W, n_pad, *, use_bf16_matmul=False):
    """Call-invariant fused operator M = A.T @ W, zero-padded to (n_pad, n_pad).

    When A / W are fixed across forward calls, compute this once and pass it to
    alista_forward(..., M_padded=...) to avoid redoing the O(n^2 m) matmul and
    its HBM round-trip on every call.
    """
    A = jnp.asarray(A, jnp.float32)
    W = jnp.asarray(W, jnp.float32)
    n = A.shape[1]
    M = jnp.dot(A.T, W, precision=jax.lax.Precision.HIGHEST)          # (n, n)
    M_p = jnp.zeros((n_pad, n_pad), jnp.float32).at[:n, :n].set(M)
    return M_p.astype(jnp.bfloat16 if use_bf16_matmul else jnp.float32)


def alista_forward(y, A, W, thr, step, num_iter, *,
                   batch_tile=None, iter_chunk=None,
                   use_bf16_matmul=False, M_padded=None):
    """y: (B, m). A (== D): (m, n). W: (m, n). thr/step: (num_iter,).

    Returns (num_iter, B, n) f32 — the stacked per-iteration outputs
    (the PyTorch module returns the same tensors as a Python list).
    NOTE: the soft-threshold identity and zero-padding invariance assume
    thr[t] >= 0 (true for the module's initialization 0.1/alpha).
    """
    y = jnp.asarray(y, jnp.float32)
    thr = jnp.asarray(thr, jnp.float32).reshape(num_iter)
    step = jnp.asarray(step, jnp.float32).reshape(num_iter)

    B, m = y.shape
    A = jnp.asarray(A, jnp.float32)
    W = jnp.asarray(W, jnp.float32)
    n = A.shape[1]

    # ---- padded / tiled sizes -------------------------------------------
    Np = _round_up(max(n, 128), 128)                       # lane dim
    if batch_tile is None:
        # >=256-row LHS tiles fill the 256-wide MXU on v6e/v7x at real batch;
        # tiny batches collapse to a single 8-row tile.
        batch_tile = min(256, _round_up(max(B, 8), 8))
    TB = _round_up(batch_tile, 8)                          # sublane dim
    Bp = _round_up(max(B, TB), TB)

    if iter_chunk is None:
        iter_chunk = min(num_iter, 8)
    padded_iter = _round_up(num_iter, iter_chunk)

    # ---- iteration-invariant precomputes (outside the kernel) ------------
    if M_padded is None:
        M_p = precompute_alista_operator(A, W, Np, use_bf16_matmul=use_bf16_matmul)
    else:
        M_p = jnp.asarray(M_padded)
        M_p = M_p.astype(jnp.bfloat16 if use_bf16_matmul else jnp.float32)

    c = jnp.dot(y, W, precision=jax.lax.Precision.HIGHEST)            # (B, n)
    c_p = jnp.zeros((Bp, Np), jnp.float32).at[:B, :n].set(c)

    # Padded iterations use thr = step = 0 -> d passes through unchanged.
    thr_p = jnp.zeros((padded_iter,), jnp.float32).at[:num_iter].set(thr)
    step_p = jnp.zeros((padded_iter,), jnp.float32).at[:num_iter].set(step)

    nb = Bp // TB
    nchunks = padded_iter // iter_chunk

    out = pl.pallas_call(
        alista_kernel,
        out_shape=jax.ShapeDtypeStruct((padded_iter, Bp, Np), jnp.float32),
        grid=(nb, nchunks),
        in_specs=[
            pl.BlockSpec(memory_space=pltpu.MemorySpace.SMEM),           # thr
            pl.BlockSpec(memory_space=pltpu.MemorySpace.SMEM),           # step
            pl.BlockSpec((TB, Np), lambda b, ic: (b, 0)),                # c tile
            pl.BlockSpec((Np, Np), lambda b, ic: (0, 0)),                # M (broadcast)
        ],
        out_specs=pl.BlockSpec((iter_chunk, TB, Np), lambda b, ic: (ic, b, 0)),
        scratch_shapes=[pltpu.VMEM((TB, Np), jnp.float32)],              # carried d
        compiler_params=pltpu.CompilerParams(
            dimension_semantics=("parallel", "arbitrary")),
    )(thr_p, step_p, c_p, M_p)

    return out[:num_iter, :B, :n]


def reference_forward(y, A, W, thr, step, num_iter):
    """Pure-numpy reference mirroring the PyTorch loop."""
    y = np.asarray(y, np.float32)
    A = np.asarray(A, np.float32)
    W = np.asarray(W, np.float32)
    d = np.zeros((y.shape[0], A.shape[1]), np.float32)
    xs = []
    for t in range(num_iter):
        z = d - step[t] * ((d @ A.T - y) @ W)
        d = np.sign(z) * np.maximum(np.abs(z) - thr[t], 0.0)
        xs.append(d.copy())
    return np.stack(xs, axis=0)


if __name__ == "__main__":
    # Small, deterministic problem sizes.
    m, n = 16, 32          # dictionary D is (m, n)
    batch = 4
    num_iter = 6
    alpha = 1.0

    key = jax.random.PRNGKey(0)
    k_d, k_y = jax.random.split(key, 2)

    # Dictionary D and analytic weight matrix W (as in ALISTA.__init__).
    D = np.asarray(jax.random.normal(k_d, (m, n), dtype=jnp.float32), np.float64)
    D /= np.linalg.norm(D, axis=0, keepdims=True)
    W = np.linalg.inv(D @ D.T) @ D
    for i in range(n):
        w = W[:, i]
        w = w / w.dot(D[:, i])
        W[:, i] = w
    D = D.astype(np.float32)
    W = W.astype(np.float32)

    # Parameters (after weights_init with thr_val=None): thr = 0.1/alpha, step = 1.
    thr = np.full((num_iter,), 0.1 / alpha, np.float32)
    step = np.ones((num_iter,), np.float32)
    assert np.all(thr >= 0.0), "soft-threshold identity requires thr >= 0"

    # Measurement y.
    y = jax.random.normal(k_y, (batch, m), dtype=jnp.float32)

    out = alista_forward(y, D, W, thr, step, num_iter)
    out = jax.block_until_ready(out)

    ref = reference_forward(np.asarray(y), D, W, thr, step, num_iter)
    # The fused d@(A.T@W) - y@W reassociates the f32 matmuls relative to the
    # reference's (d@A.T - y)@W, hence the slightly loosened rtol.
    np.testing.assert_allclose(np.asarray(out), ref, rtol=1e-4, atol=1e-5)

    print("KERNEL_OK")
</pallas_src>

<mosaic_0001>
module attributes {stable_mosaic.version = 11 : i64} {
  func.func @alista_kernel(%arg0: i32, %arg1: i32, %arg2: memref<6xf32, #tpu.memory_space<smem>>, %arg3: memref<6xf32, #tpu.memory_space<smem>>, %arg4: memref<8x128xf32, #tpu.memory_space<vmem>>, %arg5: memref<128x128xf32, #tpu.memory_space<vmem>>, %arg6: memref<6x8x128xf32, #tpu.memory_space<vmem>>, %arg7: memref<8x128xf32, #tpu.memory_space<vmem>>) attributes {dimension_semantics = [#tpu.dimension_semantics<parallel>, #tpu.dimension_semantics<arbitrary>], iteration_bounds = array<i64: 1, 1>, scalar_prefetch = 0 : i64, scratch_operands = 1 : i64, tpu.core_type = #tpu.core_type<tc>, window_params = [{transform_indices = @transform_0, window_bounds = array<i64: 6>}, {transform_indices = @transform_1, window_bounds = array<i64: 6>}, {transform_indices = @transform_2, window_bounds = array<i64: 8, 128>}, {pipeline_mode = #tpu.pipeline_mode<synchronous>, transform_indices = @transform_3, window_bounds = array<i64: 128, 128>}, {transform_indices = @transform_4, window_bounds = array<i64: 6, 8, 128>}]} {
    %c0_i32 = arith.constant 0 : i32
    %0 = arith.cmpi eq, %arg1, %c0_i32 : i32
    %1 = arith.extui %0 : i1 to i32
    %c0_i32_0 = arith.constant 0 : i32
    %2 = arith.cmpi ne, %1, %c0_i32_0 : i32
    scf.if %2 {
      %cst_43 = arith.constant 0.000000e+00 : f32
      %127 = vector.broadcast %cst_43 : f32 to vector<8x128xf32>
      %c0_44 = arith.constant 0 : index
      %c0_45 = arith.constant 0 : index
      %128 = vector.load %arg7[%c0_44, %c0_45] : memref<8x128xf32, #tpu.memory_space<vmem>>, vector<8x128xf32>
      tpu.vector_store %arg7[%c0_44, %c0_45], %127 {strides = array<i32>} : memref<8x128xf32, #tpu.memory_space<vmem>>, vector<8x128xf32>,
    } else {
    }
    %c0 = arith.constant 0 : index
    %c0_1 = arith.constant 0 : index
    %3 = vector.load %arg4[%c0, %c0_1] : memref<8x128xf32, #tpu.memory_space<vmem>>, vector<8x128xf32>
    %c0_2 = arith.constant 0 : index
    %c0_3 = arith.constant 0 : index
    %4 = vector.load %arg7[%c0_2, %c0_3] : memref<8x128xf32, #tpu.memory_space<vmem>>, vector<8x128xf32>
    %c6_i32 = arith.constant 6 : i32
    %5 = arith.muli %arg1, %c6_i32 : i32
    %c0_i32_4 = arith.constant 0 : i32
    %6 = arith.addi %5, %c0_i32_4 : i32
    %c0_5 = arith.constant 0 : index
    %c0_6 = arith.constant 0 : index
    %7 = vector.load %arg5[%c0_5, %c0_6] : memref<128x128xf32, #tpu.memory_space<vmem>>, vector<128x128xf32>
    %cst = arith.constant dense<0.000000e+00> : vector<8x128xf32>
    %8 = tpu.matmul %4, %7, %cst {dimension_numbers = #tpu.dot_dimension_numbers<[1], [0], [0], [1], [0, 0, 1, 1], [], []>} : vector<8x128xf32>, vector<128x128xf32>, vector<8x128xf32> -> vector<8x128xf32>
    %9 = arith.subf %8, %3 : vector<8x128xf32>
    %10 = arith.index_cast %6 : i32 to index
    %11 = memref.load %arg3[%10] : memref<6xf32, #tpu.memory_space<smem>>
    %12 = vector.broadcast %11 : f32 to vector<8x128xf32>
    %13 = arith.mulf %12, %9 : vector<8x128xf32>
    %14 = arith.subf %4, %13 : vector<8x128xf32>
    %15 = arith.index_cast %6 : i32 to index
    %16 = memref.load %arg2[%15] : memref<6xf32, #tpu.memory_space<smem>>
    %cst_7 = arith.constant 0.000000e+00 : f32
    %17 = arith.subf %cst_7, %16 : f32
    %18 = vector.broadcast %17 : f32 to vector<8x128xf32>
    %19 = arith.maximumf %18, %14 : vector<8x128xf32>
    %20 = vector.broadcast %16 : f32 to vector<8x128xf32>
    %21 = arith.minimumf %20, %19 : vector<8x128xf32>
    %22 = arith.subf %14, %21 : vector<8x128xf32>
    %c0_8 = arith.constant 0 : index
    %c0_9 = arith.constant 0 : index
    %c0_10 = arith.constant 0 : index
    %23 = vector.load %arg6[%c0_8, %c0_9, %c0_10] : memref<6x8x128xf32, #tpu.memory_space<vmem>>, vector<1x8x128xf32>
    %24 = vector.shape_cast %23 : vector<1x8x128xf32> to vector<8x128xf32>
    %25 = vector.shape_cast %22 : vector<8x128xf32> to vector<1x8x128xf32>
    tpu.vector_store %arg6[%c0_8, %c0_9, %c0_10], %25 {strides = array<i32>} : memref<6x8x128xf32, #tpu.memory_space<vmem>>, vector<1x8x128xf32>,
    %c1_i32 = arith.constant 1 : i32
    %26 = arith.addi %5, %c1_i32 : i32
    %c0_11 = arith.constant 0 : index
    %c0_12 = arith.constant 0 : index
    %27 = vector.load %arg5[%c0_11, %c0_12] : memref<128x128xf32, #tpu.memory_space<vmem>>, vector<128x128xf32>
    %cst_13 = arith.constant dense<0.000000e+00> : vector<8x128xf32>
    %28 = tpu.matmul %22, %27, %cst_13 {dimension_numbers = #tpu.dot_dimension_numbers<[1], [0], [0], [1], [0, 0, 1, 1], [], []>} : vector<8x128xf32>, vector<128x128xf32>, vector<8x128xf32> -> vector<8x128xf32>
    %29 = arith.subf %28, %3 : vector<8x128xf32>
    %30 = arith.index_cast %26 : i32 to index
    %31 = memref.load %arg3[%30] : memref<6xf32, #tpu.memory_space<smem>>
    %32 = vector.broadcast %31 : f32 to vector<8x128xf32>
    %33 = arith.mulf %32, %29 : vector<8x128xf32>
    %34 = arith.subf %22, %33 : vector<8x128xf32>
    %35 = arith.index_cast %26 : i32 to index
    %36 = memref.load %arg2[%35] : memref<6xf32, #tpu.memory_space<smem>>
    %cst_14 = arith.constant 0.000000e+00 : f32
    %37 = arith.subf %cst_14, %36 : f32
    %38 = vector.broadcast %37 : f32 to vector<8x128xf32>
    %39 = arith.maximumf %38, %34 : vector<8x128xf32>
    %40 = vector.broadcast %36 : f32 to vector<8x128xf32>
    %41 = arith.minimumf %40, %39 : vector<8x128xf32>
    %42 = arith.subf %34, %41 : vector<8x128xf32>
    %c1 = arith.constant 1 : index
    %c0_15 = arith.constant 0 : index
    %c0_16 = arith.constant 0 : index
    %43 = vector.load %arg6[%c1, %c0_15, %c0_16] : memref<6x8x128xf32, #tpu.memory_space<vmem>>, vector<1x8x128xf32>
    %44 = vector.shape_cast %43 : vector<1x8x128xf32> to vector<8x128xf32>
    %45 = vector.shape_cast %42 : vector<8x128xf32> to vector<1x8x128xf32>
    tpu.vector_store %arg6[%c1, %c0_15, %c0_16], %45 {strides = array<i32>} : memref<6x8x128xf32, #tpu.memory_space<vmem>>, vector<1x8x128xf32>,
    %c2_i32 = arith.constant 2 : i32
    %46 = arith.addi %5, %c2_i32 : i32
    %c0_17 = arith.constant 0 : index
    %c0_18 = arith.constant 0 : index
    %47 = vector.load %arg5[%c0_17, %c0_18] : memref<128x128xf32, #tpu.memory_space<vmem>>, vector<128x128xf32>
    %cst_19 = arith.constant dense<0.000000e+00> : vector<8x128xf32>
    %48 = tpu.matmul %42, %47, %cst_19 {dimension_numbers = #tpu.dot_dimension_numbers<[1], [0], [0], [1], [0, 0, 1, 1], [], []>} : vector<8x128xf32>, vector<128x128xf32>, vector<8x128xf32> -> vector<8x128xf32>
    %49 = arith.subf %48, %3 : vector<8x128xf32>
    %50 = arith.index_cast %46 : i32 to index
    %51 = memref.load %arg3[%50] : memref<6xf32, #tpu.memory_space<smem>>
    %52 = vector.broadcast %51 : f32 to vector<8x128xf32>
    %53 = arith.mulf %52, %49 : vector<8x128xf32>
    %54 = arith.subf %42, %53 : vector<8x128xf32>
    %55 = arith.index_cast %46 : i32 to index
    %56 = memref.load %arg2[%55] : memref<6xf32, #tpu.memory_space<smem>>
    %cst_20 = arith.constant 0.000000e+00 : f32
    %57 = arith.subf %cst_20, %56 : f32
    %58 = vector.broadcast %57 : f32 to vector<8x128xf32>
    %59 = arith.maximumf %58, %54 : vector<8x128xf32>
    %60 = vector.broadcast %56 : f32 to vector<8x128xf32>
    %61 = arith.minimumf %60, %59 : vector<8x128xf32>
    %62 = arith.subf %54, %61 : vector<8x128xf32>
    %c2 = arith.constant 2 : index
    %c0_21 = arith.constant 0 : index
    %c0_22 = arith.constant 0 : index
    %63 = vector.load %arg6[%c2, %c0_21, %c0_22] : memref<6x8x128xf32, #tpu.memory_space<vmem>>, vector<1x8x128xf32>
    %64 = vector.shape_cast %63 : vector<1x8x128xf32> to vector<8x128xf32>
    %65 = vector.shape_cast %62 : vector<8x128xf32> to vector<1x8x128xf32>
    tpu.vector_store %arg6[%c2, %c0_21, %c0_22], %65 {strides = array<i32>} : memref<6x8x128xf32, #tpu.memory_space<vmem>>, vector<1x8x128xf32>,
    %c3_i32 = arith.constant 3 : i32
    %66 = arith.addi %5, %c3_i32 : i32
    %c0_23 = arith.constant 0 : index
    %c0_24 = arith.constant 0 : index
    %67 = vector.load %arg5[%c0_23, %c0_24] : memref<128x128xf32, #tpu.memory_space<vmem>>, vector<128x128xf32>
    %cst_25 = arith.constant dense<0.000000e+00> : vector<8x128xf32>
    %68 = tpu.matmul %62, %67, %cst_25 {dimension_numbers = #tpu.dot_dimension_numbers<[1], [0], [0], [1], [0, 0, 1, 1], [], []>} : vector<8x128xf32>, vector<128x128xf32>, vector<8x128xf32> -> vector<8x128xf32>
    %69 = arith.subf %68, %3 : vector<8x128xf32>
    %70 = arith.index_cast %66 : i32 to index
    %71 = memref.load %arg3[%70] : memref<6xf32, #tpu.memory_space<smem>>
    %72 = vector.broadcast %71 : f32 to vector<8x128xf32>
    %73 = arith.mulf %72, %69 : vector<8x128xf32>
    %74 = arith.subf %62, %73 : vector<8x128xf32>
    %75 = arith.index_cast %66 : i32 to index
    %76 = memref.load %arg2[%75] : memref<6xf32, #tpu.memory_space<smem>>
    %cst_26 = arith.constant 0.000000e+00 : f32
    %77 = arith.subf %cst_26, %76 : f32
    %78 = vector.broadcast %77 : f32 to vector<8x128xf32>
    %79 = arith.maximumf %78, %74 : vector<8x128xf32>
    %80 = vector.broadcast %76 : f32 to vector<8x128xf32>
    %81 = arith.minimumf %80, %79 : vector<8x128xf32>
    %82 = arith.subf %74, %81 : vector<8x128xf32>
    %c3 = arith.constant 3 : index
    %c0_27 = arith.constant 0 : index
    %c0_28 = arith.constant 0 : index
    %83 = vector.load %arg6[%c3, %c0_27, %c0_28] : memref<6x8x128xf32, #tpu.memory_space<vmem>>, vector<1x8x128xf32>
    %84 = vector.shape_cast %83 : vector<1x8x128xf32> to vector<8x128xf32>
    %85 = vector.shape_cast %82 : vector<8x128xf32> to vector<1x8x128xf32>
    tpu.vector_store %arg6[%c3, %c0_27, %c0_28], %85 {strides = array<i32>} : memref<6x8x128xf32, #tpu.memory_space<vmem>>, vector<1x8x128xf32>,
    %c4_i32 = arith.constant 4 : i32
    %86 = arith.addi %5, %c4_i32 : i32
    %c0_29 = arith.constant 0 : index
    %c0_30 = arith.constant 0 : index
    %87 = vector.load %arg5[%c0_29, %c0_30] : memref<128x128xf32, #tpu.memory_space<vmem>>, vector<128x128xf32>
    %cst_31 = arith.constant dense<0.000000e+00> : vector<8x128xf32>
    %88 = tpu.matmul %82, %87, %cst_31 {dimension_numbers = #tpu.dot_dimension_numbers<[1], [0], [0], [1], [0, 0, 1, 1], [], []>} : vector<8x128xf32>, vector<128x128xf32>, vector<8x128xf32> -> vector<8x128xf32>
    %89 = arith.subf %88, %3 : vector<8x128xf32>
    %90 = arith.index_cast %86 : i32 to index
    %91 = memref.load %arg3[%90] : memref<6xf32, #tpu.memory_space<smem>>
    %92 = vector.broadcast %91 : f32 to vector<8x128xf32>
    %93 = arith.mulf %92, %89 : vector<8x128xf32>
    %94 = arith.subf %82, %93 : vector<8x128xf32>
    %95 = arith.index_cast %86 : i32 to index
    %96 = memref.load %arg2[%95] : memref<6xf32, #tpu.memory_space<smem>>
    %cst_32 = arith.constant 0.000000e+00 : f32
    %97 = arith.subf %cst_32, %96 : f32
    %98 = vector.broadcast %97 : f32 to vector<8x128xf32>
    %99 = arith.maximumf %98, %94 : vector<8x128xf32>
    %100 = vector.broadcast %96 : f32 to vector<8x128xf32>
    %101 = arith.minimumf %100, %99 : vector<8x128xf32>
    %102 = arith.subf %94, %101 : vector<8x128xf32>
    %c4 = arith.constant 4 : index
    %c0_33 = arith.constant 0 : index
    %c0_34 = arith.constant 0 : index
    %103 = vector.load %arg6[%c4, %c0_33, %c0_34] : memref<6x8x128xf32, #tpu.memory_space<vmem>>, vector<1x8x128xf32>
    %104 = vector.shape_cast %103 : vector<1x8x128xf32> to vector<8x128xf32>
    %105 = vector.shape_cast %102 : vector<8x128xf32> to vector<1x8x128xf32>
    tpu.vector_store %arg6[%c4, %c0_33, %c0_34], %105 {strides = array<i32>} : memref<6x8x128xf32, #tpu.memory_space<vmem>>, vector<1x8x128xf32>,
    %c5_i32 = arith.constant 5 : i32
    %106 = arith.addi %5, %c5_i32 : i32
    %c0_35 = arith.constant 0 : index
    %c0_36 = arith.constant 0 : index
    %107 = vector.load %arg5[%c0_35, %c0_36] : memref<128x128xf32, #tpu.memory_space<vmem>>, vector<128x128xf32>
    %cst_37 = arith.constant dense<0.000000e+00> : vector<8x128xf32>
    %108 = tpu.matmul %102, %107, %cst_37 {dimension_numbers = #tpu.dot_dimension_numbers<[1], [0], [0], [1], [0, 0, 1, 1], [], []>} : vector<8x128xf32>, vector<128x128xf32>, vector<8x128xf32> -> vector<8x128xf32>
    %109 = arith.subf %108, %3 : vector<8x128xf32>
    %110 = arith.index_cast %106 : i32 to index
    %111 = memref.load %arg3[%110] : memref<6xf32, #tpu.memory_space<smem>>
    %112 = vector.broadcast %111 : f32 to vector<8x128xf32>
    %113 = arith.mulf %112, %109 : vector<8x128xf32>
    %114 = arith.subf %102, %113 : vector<8x128xf32>
    %115 = arith.index_cast %106 : i32 to index
    %116 = memref.load %arg2[%115] : memref<6xf32, #tpu.memory_space<smem>>
    %cst_38 = arith.constant 0.000000e+00 : f32
    %117 = arith.subf %cst_38, %116 : f32
    %118 = vector.broadcast %117 : f32 to vector<8x128xf32>
    %119 = arith.maximumf %118, %114 : vector<8x128xf32>
    %120 = vector.broadcast %116 : f32 to vector<8x128xf32>
    %121 = arith.minimumf %120, %119 : vector<8x128xf32>
    %122 = arith.subf %114, %121 : vector<8x128xf32>
    %c5 = arith.constant 5 : index
    %c0_39 = arith.constant 0 : index
    %c0_40 = arith.constant 0 : index
    %123 = vector.load %arg6[%c5, %c0_39, %c0_40] : memref<6x8x128xf32, #tpu.memory_space<vmem>>, vector<1x8x128xf32>
    %124 = vector.shape_cast %123 : vector<1x8x128xf32> to vector<8x128xf32>
    %125 = vector.shape_cast %122 : vector<8x128xf32> to vector<1x8x128xf32>
    tpu.vector_store %arg6[%c5, %c0_39, %c0_40], %125 {strides = array<i32>} : memref<6x8x128xf32, #tpu.memory_space<vmem>>, vector<1x8x128xf32>,
    %c0_41 = arith.constant 0 : index
    %c0_42 = arith.constant 0 : index
    %126 = vector.load %arg7[%c0_41, %c0_42] : memref<8x128xf32, #tpu.memory_space<vmem>>, vector<8x128xf32>
    tpu.vector_store %arg7[%c0_41, %c0_42], %122 {strides = array<i32>} : memref<8x128xf32, #tpu.memory_space<vmem>>, vector<8x128xf32>,
    return
  }
  func.func @transform_0(%arg0: i32, %arg1: i32) -> i32 {
    %c0_i32 = arith.constant 0 : i32
    %c0_i32_0 = arith.constant 0 : i32
    return %c0_i32 : i32
  }
  func.func @transform_1(%arg0: i32, %arg1: i32) -> i32 {
    %c0_i32 = arith.constant 0 : i32
    %c0_i32_0 = arith.constant 0 : i32
    return %c0_i32 : i32
  }
  func.func @transform_2(%arg0: i32, %arg1: i32) -> (i32, i32) {
    %c0_i32 = arith.constant 0 : i32
    %c0_i32_0 = arith.constant 0 : i32
    return %arg0, %c0_i32 : i32, i32
  }
  func.func @transform_3(%arg0: i32, %arg1: i32) -> (i32, i32) {
    %c0_i32 = arith.constant 0 : i32
    %c0_i32_0 = arith.constant 0 : i32
    %c0_i32_1 = arith.constant 0 : i32
    return %c0_i32, %c0_i32_0 : i32, i32
  }
  func.func @transform_4(%arg0: i32, %arg1: i32) -> (i32, i32, i32) {
    %c0_i32 = arith.constant 0 : i32
    %c0_i32_0 = arith.constant 0 : i32
    return %arg1, %arg0, %c0_i32 : i32, i32, i32
  }
}

</mosaic_0001>

<bundles_post_ra>
// kernel: tpu_custom_call.1
= control target key start
LH: loop header
LB: loop body
LE: loop exit
PB: predicated region body
PF: predicated region fallthrough
CT: control target
= control target key end

     0   :  { %9 = vsyncpa [#allocation6], 0  ;;  %s666_s0 = inlined_call_operand.hbm [shape: f32[6], index: 0, kind: input, shape index: {}]   ;;  %s667_s1 = inlined_call_operand.hbm [shape: f32[6], index: 1, kind: input, shape index: {}]   ;;  %s668_s2 = inlined_call_operand.hbm [shape: f32[8,128], index: 2, kind: input, shape index: {}]   ;;  %s669_s3 = inlined_call_operand.hbm [shape: f32[128,128], index: 3, kind: input, shape index: {}]   ;;  %s670_s4 = inlined_call_operand.hbm [shape: f32[6,8,128], index: 4, kind: output, shape index: {}]  }
   0x1   :  { %10 = vsyncpa [#allocation8], 0 }
   0x2   :  { %11 = vsyncpa [#allocation4], 0 }
   0x3   :  { %12 = vsyncpa [#allocation11], 0 }
   0x4   :  { %13 = vsyncpa [#allocation5], 0  ;;  %s19_s17 = sshll.u32 %s666_s0, 4  ;;  %s28_s20 = sshll.u32 %s667_s1, 4  ;;  %s20_s17 = int_to_ptr.hbm [resolvable:$true] %s19_s17  ;;  %s29_s20 = int_to_ptr.hbm [resolvable:$true] %s28_s20 }
   0x5   :  { %s532_s21 = smov [#allocation3]   ;;  %s533_s22 = smov [#allocation7]  }
   0x6   :  { %22 = dma.hbm_to_smem %s20_s17, 16, %s532_s21, [#allocation6]  }
   0x7   :  { %31 = dma.hbm_to_smem %s29_s20, 16, %s533_s22, [#allocation8]  }
   0x8   :  { %s37_s25 = sshll.u32 %s668_s2, 4  ;;  %s534_s26 = smov [#allocation9]   ;;  %s38_s25 = int_to_ptr.hbm [resolvable:$true] %s37_s25 }
   0x9   :  { %s39_s27 = sshll.u32 %s534_s26, 4  ;;  %s47_s29 = sshll.u32 %s669_s3, 4  ;;  %s40_s27 = int_to_ptr.vmem [resolvable:$true] %s39_s27  ;;  %s48_s29 = int_to_ptr.hbm [resolvable:$true] %s47_s29 }
   0xa   :  { %42 = dma.hbm_to_vmem [thread:$0]  %s38_s25, 128, %s40_s27, [#allocation4]  }
   0xb   :  { %s535_s1 = smov [#allocation10]   ;;  %s536_s5 = smov 128  }
   0xc   :  { %s49_s30 = sshll.u32 %s535_s1, 4  ;;  %s537_s6 = smov 8   ;;  %s50_s30 = int_to_ptr.vmem [resolvable:$true] %s49_s30 }
   0xd   :  { %55 = dma.hbm_to_vmem [thread:$0]  %s48_s29, 2048, %s50_s30, [#allocation11], %s536_s5, %s536_s5, %s537_s6  }
   0xe   :  { %522 = dma.done.wait [#allocation6], 16  }
   0xf   :  { %523 = vsyncadd [#allocation6], 4294967280 }
  0x10   :  { %524 = dma.done.wait [#allocation8], 16  }
  0x11   :  { %525 = vsyncadd [#allocation8], 4294967280 }
  0x12   :  { %526 = dma.done.wait [#allocation4], 128  }
  0x13   :  { %527 = vsyncadd [#allocation4], 4294967168 }
  0x14   :  { %528 = dma.done.wait [#allocation11], 2048  }
  0x15   :  { %529 = vsyncadd [#allocation11], 4294965248 }
  0x16   :  { %72 = sfence }
  0x17   :  { %v580_v0 = vld [vmem:[#allocation10 + $0x78] sm:$0xff]  ;;  %v582_v1 = vld [vmem:[#allocation10 + $0x70] sm:$0xff]  ;;  %v586_v2 = vld [vmem:[#allocation10 + $0x68] sm:$0xff]  ;;  %v538_v16 = vmov 0.0   ;;  %s118_s2 = sld [smem:[#allocation7]]  ;;  %s539_s23 = smov [#allocation12]  }
  0x18   :  { %97 = vmatpush.msra.mxu0 %v580_v0  ;;  %147 = vmatpush.msra.mxu1 %v580_v0  ;;  %v592_v3 = vld [vmem:[#allocation10 + $0x60] sm:$0xff]  ;;  %v598_v4 = vld [vmem:[#allocation10 + $0x58] sm:$0xff]  ;;  %v604_v5 = vld [vmem:[#allocation10 + $0x50] sm:$0xff]  ;;  %s122_s3 = sld [smem:[#allocation3]]  ;;  %s390_s24 = sshll.u32 %s539_s23, 4  ;;  %s391_s24 = int_to_ptr.vmem [resolvable:$true] %s390_s24 }
  0x19   :  { %198 = vmatpush.msra.mxu2 %v580_v0  ;;  %249 = vmatpush.msra.mxu3 %v580_v0  ;;  %v610_v6 = vld [vmem:[#allocation10 + $0x48] sm:$0xff]  ;;  %v616_v7 = vld [vmem:[#allocation10 + $0x40] sm:$0xff]  ;;  %v622_v8 = vld [vmem:[#allocation10 + $0x38] sm:$0xff]  ;;  %s408_s8 = sld [smem:[#allocation7 + $0x1]]  ;;  %s392_s27 = sshll.u32 %s670_s4, 4  ;;  %s393_s27 = int_to_ptr.hbm [resolvable:$true] %s392_s27 }
  0x1a   :  { %98 = vmatpush.msra.mxu0 %v582_v1  ;;  %148 = vmatpush.msra.mxu1 %v582_v1  ;;  %v87_v9 = vld [vmem:[#allocation10 + $0x30] sm:$0xff]  ;;  %v86_v10 = vld [vmem:[#allocation10 + $0x28] sm:$0xff]  ;;  %v85_v11 = vld [vmem:[#allocation10 + $0x20] sm:$0xff]  ;;  %s409_s9 = sld [smem:[#allocation3 + $0x1]] }
  0x1b   :  { %199 = vmatpush.msra.mxu2 %v582_v1  ;;  %250 = vmatpush.msra.mxu3 %v582_v1  ;;  %v84_v12 = vld [vmem:[#allocation10 + $0x18] sm:$0xff]  ;;  %v83_v13 = vld [vmem:[#allocation10 + $0x10] sm:$0xff]  ;;  %v82_v14 = vld [vmem:[#allocation10 + $0x8] sm:$0xff]  ;;  %s410_s11 = sld [smem:[#allocation7 + $0x2]] }
  0x1c   :  { %99 = vmatpush.msra.mxu0 %v586_v2  ;;  %149 = vmatpush.msra.mxu1 %v586_v2  ;;  %v81_v15 = vld [vmem:[#allocation10] sm:$0xff]  ;;  %v652_v17 = vld [vmem:[#allocation9] sm:$0xff]  ;;  %s411_s12 = sld [smem:[#allocation3 + $0x2]] }
  0x1d   :  { %200 = vmatpush.msra.mxu2 %v586_v2  ;;  %251 = vmatpush.msra.mxu3 %v586_v2  ;;  %v119_v19 = vstv %s118_s2  ;;  %s412_s14 = sld [smem:[#allocation7 + $0x3]] }
  0x1e   :  { %100 = vmatpush.msra.mxu0 %v592_v3  ;;  %150 = vmatpush.msra.mxu1 %v592_v3  ;;  %s123_s7 = ssub.f32 0.0, %s122_s3  ;;  %v126_v24 = vstv %s122_s3 }
  0x1f   :  { %201 = vmatpush.msra.mxu2 %v592_v3  ;;  %252 = vmatpush.msra.mxu3 %v592_v3  ;;  %v169_v29 = vstv %s408_s8  ;;  %s413_s15 = sld [smem:[#allocation3 + $0x3]] }
  0x20   :  { %101 = vmatpush.msra.mxu0 %v598_v4  ;;  %151 = vmatpush.msra.mxu1 %v598_v4  ;;  %v124_v22 = vstv %s123_s7  ;;  %s173_s10 = ssub.f32 0.0, %s409_s9  ;;  %v176_v34 = vstv %s409_s9 }
  0x21   :  { %202 = vmatpush.msra.mxu2 %v598_v4  ;;  %253 = vmatpush.msra.mxu3 %v598_v4  ;;  %v220_v39 = vstv %s410_s11  ;;  %s414_s17 = sld [smem:[#allocation7 + $0x4]] }
  0x22   :  { %102 = vmatpush.msra.mxu0 %v604_v5  ;;  %152 = vmatpush.msra.mxu1 %v604_v5  ;;  %v174_v32 = vstv %s173_s10  ;;  %s224_s13 = ssub.f32 0.0, %s411_s12  ;;  %v227_v44 = vstv %s411_s12 }
  0x23   :  { %203 = vmatpush.msra.mxu2 %v604_v5  ;;  %254 = vmatpush.msra.mxu3 %v604_v5  ;;  %v271_v49 = vstv %s412_s14  ;;  %s415_s18 = sld [smem:[#allocation3 + $0x4]] }
  0x24   :  { %103 = vmatpush.msra.mxu0 %v610_v6  ;;  %153 = vmatpush.msra.mxu1 %v610_v6  ;;  %v225_v42 = vstv %s224_s13  ;;  %s416_s20 = sld [smem:[#allocation7 + $0x5]] }
  0x25   :  { %204 = vmatpush.msra.mxu2 %v610_v6  ;;  %255 = vmatpush.msra.mxu3 %v610_v6  ;;  %s275_s16 = ssub.f32 0.0, %s413_s15  ;;  %v278_v54 = vstv %s413_s15 }
  0x26   :  { %104 = vmatpush.msra.mxu0 %v616_v7  ;;  %154 = vmatpush.msra.mxu1 %v616_v7  ;;  %s417_s21 = sld [smem:[#allocation3 + $0x5]] }
  0x27   :  { %205 = vmatpush.msra.mxu2 %v616_v7  ;;  %256 = vmatpush.msra.mxu3 %v616_v7  ;;  %v276_v52 = vstv %s275_s16  ;;  %v322_v59 = vstv %s414_s17 }
  0x28   :  { %105 = vmatpush.msra.mxu0 %v622_v8  ;;  %155 = vmatpush.msra.mxu1 %v622_v8 }
  0x29   :  { %206 = vmatpush.msra.mxu2 %v622_v8  ;;  %257 = vmatpush.msra.mxu3 %v622_v8  ;;  %s326_s19 = ssub.f32 0.0, %s415_s18 }
  0x2a   :  { %106 = vmatpush.msra.mxu0 %v87_v9  ;;  %156 = vmatpush.msra.mxu1 %v87_v9 }
  0x2b   :  { %207 = vmatpush.msra.mxu2 %v87_v9  ;;  %258 = vmatpush.msra.mxu3 %v87_v9  ;;  %v327_v62 = vstv %s326_s19 }
  0x2c   :  { %107 = vmatpush.msra.mxu0 %v86_v10  ;;  %157 = vmatpush.msra.mxu1 %v86_v10  ;;  %s377_s22 = ssub.f32 0.0, %s417_s21 }
  0x2d   :  { %208 = vmatpush.msra.mxu2 %v86_v10  ;;  %259 = vmatpush.msra.mxu3 %v86_v10 }
  0x2e   :  { %108 = vmatpush.msra.mxu0 %v85_v11  ;;  %158 = vmatpush.msra.mxu1 %v85_v11 }
  0x2f   :  { %209 = vmatpush.msra.mxu2 %v85_v11  ;;  %260 = vmatpush.msra.mxu3 %v85_v11 }
  0x30   :  { %109 = vmatpush.msra.mxu0 %v84_v12  ;;  %159 = vmatpush.msra.mxu1 %v84_v12 }
  0x31   :  { %210 = vmatpush.msra.mxu2 %v84_v12  ;;  %261 = vmatpush.msra.mxu3 %v84_v12 }
  0x32   :  { %110 = vmatpush.msra.mxu0 %v83_v13  ;;  %160 = vmatpush.msra.mxu1 %v83_v13 }
  0x33   :  { %211 = vmatpush.msra.mxu2 %v83_v13  ;;  %262 = vmatpush.msra.mxu3 %v83_v13 }
  0x34   :  { %111 = vmatpush.msra.mxu0 %v82_v14  ;;  %161 = vmatpush.msra.mxu1 %v82_v14 }
  0x35   :  { %212 = vmatpush.msra.mxu2 %v82_v14  ;;  %263 = vmatpush.msra.mxu3 %v82_v14 }
  0x36   :  { %112 = vmatpush.msra.mxu0 %v81_v15  ;;  %162 = vmatpush.msra.mxu1 %v81_v15 }
  0x37   :  { %113 = vmatmul.f32.vlgmr.msra.gmra.mxu0 %v538_v16  ;;  %213 = vmatpush.msra.mxu2 %v81_v15 }
  0x38   :  { %264 = vmatpush.msra.mxu3 %v81_v15  ;;  %300 = vmatpush.msrb.mxu0 %v580_v0 }
  0x39   :  { %351 = vmatpush.msrb.mxu1 %v580_v0  ;;  %v329_v0 = vstv %s415_s18 }
  0x3a   :  { %301 = vmatpush.msrb.mxu0 %v582_v1 }
  0x3b   :  { %352 = vmatpush.msrb.mxu1 %v582_v1 }
  0x3c   :  { %302 = vmatpush.msrb.mxu0 %v586_v2 }
  0x3d   :  { %353 = vmatpush.msrb.mxu1 %v586_v2 }
  0x3e   :  { %303 = vmatpush.msrb.mxu0 %v592_v3 }
  0x3f   :  { %354 = vmatpush.msrb.mxu1 %v592_v3 }
  0x40   :  { %304 = vmatpush.msrb.mxu0 %v598_v4 }
  0x41   :  { %355 = vmatpush.msrb.mxu1 %v598_v4 }
  0x42   :  { %305 = vmatpush.msrb.mxu0 %v604_v5 }
  0x43   :  { %356 = vmatpush.msrb.mxu1 %v604_v5  ;;  %v373_v5 = vstv %s416_s20 }
  0x44   :  { %306 = vmatpush.msrb.mxu0 %v610_v6 }
  0x45   :  { %357 = vmatpush.msrb.mxu1 %v610_v6 }
  0x46   :  { %307 = vmatpush.msrb.mxu0 %v616_v7 }
  0x47   :  { %358 = vmatpush.msrb.mxu1 %v616_v7 }
  0x48   :  { %308 = vmatpush.msrb.mxu0 %v622_v8 }
  0x49   :  { %359 = vmatpush.msrb.mxu1 %v622_v8  ;;  %v378_v8 = vstv %s377_s22 }
  0x4a   :  { %309 = vmatpush.msrb.mxu0 %v87_v9 }
  0x4b   :  { %360 = vmatpush.msrb.mxu1 %v87_v9 }
  0x4c   :  { %310 = vmatpush.msrb.mxu0 %v86_v10 }
  0x4d   :  { %361 = vmatpush.msrb.mxu1 %v86_v10  ;;  %v380_v10 = vstv %s417_s21 }
  0x4e   :  { %311 = vmatpush.msrb.mxu0 %v85_v11 }
  0x4f   :  { %362 = vmatpush.msrb.mxu1 %v85_v11 }
  0x50   :  { %312 = vmatpush.msrb.mxu0 %v84_v12 }
  0x51   :  { %363 = vmatpush.msrb.mxu1 %v84_v12 }
  0x52   :  { %313 = vmatpush.msrb.mxu0 %v83_v13 }
  0x53   :  { %364 = vmatpush.msrb.mxu1 %v83_v13 }
  0x54   :  { %314 = vmatpush.msrb.mxu0 %v82_v14 }
  0x55   :  { %365 = vmatpush.msrb.mxu1 %v82_v14 }
  0x56   :  { %315 = vmatpush.msrb.mxu0 %v81_v15 }
  0x57   :  { %366 = vmatpush.msrb.mxu1 %v81_v15 }
  0xb4   :  { %v114_v18 = vpop.f32.mrf.mxu0 }
  0xb5   :  { %v117_v20 = vsub.f32 %v114_v18, %v652_v17 }
  0xb7   :  { %v120_v21 = vmul.f32 %v119_v19, %v117_v20 }
  0xb9   :  { %v121_v23 = vsub.f32 0.0, %v120_v21 }
  0xbb   :  { %v125_v25 = vmax.f32 %v124_v22, %v121_v23 }
  0xbd   :  { %v127_v26 = vmin.f32 %v126_v24, %v125_v25 }
  0xbf   :  { %v128_v27 = vsub.f32 %v121_v23, %v127_v26 }
  0xc1   :  { %129 = vst [vmem:[#allocation12] sm:$0xff] %v128_v27  ;;  %163 = vmatmul.f32.vlgmr.msra.gmra.mxu1 %v128_v27 }
 0x13e   :  { %v164_v28 = vpop.f32.mrf.mxu1 }
 0x13f   :  { %v167_v30 = vsub.f32 %v164_v28, %v652_v17 }
 0x141   :  { %v170_v31 = vmul.f32 %v169_v29, %v167_v30 }
 0x143   :  { %v171_v33 = vsub.f32 %v128_v27, %v170_v31 }
 0x145   :  { %v175_v35 = vmax.f32 %v174_v32, %v171_v33 }
 0x147   :  { %v177_v36 = vmin.f32 %v176_v34, %v175_v35 }
 0x149   :  { %v178_v37 = vsub.f32 %v171_v33, %v177_v36 }
 0x14b   :  { %180 = vst [vmem:[#allocation12 + $0x8] sm:$0xff] %v178_v37  ;;  %214 = vmatmul.f32.vlgmr.msra.gmra.mxu2 %v178_v37 }
 0x1ce   :  { %v215_v38 = vpop.f32.mrf.mxu2 }
 0x1cf   :  { %v218_v40 = vsub.f32 %v215_v38, %v652_v17 }
 0x1d1   :  { %v221_v41 = vmul.f32 %v220_v39, %v218_v40 }
 0x1d3   :  { %v222_v43 = vsub.f32 %v178_v37, %v221_v41 }
 0x1d5   :  { %v226_v45 = vmax.f32 %v225_v42, %v222_v43 }
 0x1d7   :  { %v228_v46 = vmin.f32 %v227_v44, %v226_v45 }
 0x1d9   :  { %v229_v47 = vsub.f32 %v222_v43, %v228_v46 }
 0x1db   :  { %231 = vst [vmem:[#allocation12 + $0x10] sm:$0xff] %v229_v47  ;;  %265 = vmatmul.f32.vlgmr.msra.gmra.mxu3 %v229_v47 }
 0x25e   :  { %v266_v48 = vpop.f32.mrf.mxu3 }
 0x25f   :  { %v269_v50 = vsub.f32 %v266_v48, %v652_v17 }
 0x261   :  { %v272_v51 = vmul.f32 %v271_v49, %v269_v50 }
 0x263   :  { %v273_v53 = vsub.f32 %v229_v47, %v272_v51 }
 0x265   :  { %v277_v55 = vmax.f32 %v276_v52, %v273_v53 }
 0x267   :  { %v279_v56 = vmin.f32 %v278_v54, %v277_v55 }
 0x269   :  { %v280_v57 = vsub.f32 %v273_v53, %v279_v56 }
 0x26b   :  { %282 = vst [vmem:[#allocation12 + $0x18] sm:$0xff] %v280_v57  ;;  %316 = vmatmul.f32.vlgmr.msrb.gmra.mxu0 %v280_v57 }
 0x2e8   :  { %v317_v58 = vpop.f32.mrf.mxu0 }
 0x2e9   :  { %v320_v60 = vsub.f32 %v317_v58, %v652_v17 }
 0x2eb   :  { %v323_v61 = vmul.f32 %v322_v59, %v320_v60 }
 0x2ed   :  { %v324_v63 = vsub.f32 %v280_v57, %v323_v61 }
 0x2ef   :  { %v328_v1 = vmax.f32 %v327_v62, %v324_v63 }
 0x2f1   :  { %v330_v2 = vmin.f32 %v329_v0, %v328_v1 }
 0x2f3   :  { %v331_v3 = vsub.f32 %v324_v63, %v330_v2 }
 0x2f5   :  { %333 = vst [vmem:[#allocation12 + $0x20] sm:$0xff] %v331_v3  ;;  %367 = vmatmul.f32.vlgmr.msrb.gmra.mxu1 %v331_v3 }
 0x372   :  { %v368_v4 = vpop.f32.mrf.mxu1 }
 0x373   :  { %v371_v6 = vsub.f32 %v368_v4, %v652_v17 }
 0x375   :  { %v374_v7 = vmul.f32 %v373_v5, %v371_v6 }
 0x377   :  { %v375_v9 = vsub.f32 %v331_v3, %v374_v7 }
 0x379   :  { %v379_v11 = vmax.f32 %v378_v8, %v375_v9 }
 0x37b   :  { %v381_v12 = vmin.f32 %v380_v10, %v379_v11 }
 0x37d   :  { %v382_v13 = vsub.f32 %v375_v9, %v381_v12 }
 0x37f   :  { %384 = vst [vmem:[#allocation12 + $0x28] sm:$0xff] %v382_v13 }
 0x380   :  { %398 = dma.vmem_to_hbm [thread:$0]  %s391_s24, 768, %s393_s27, [#allocation5], %s536_s5, %s536_s5, %s537_s6  }
 0x381   :  { %530 = dma.done.wait [#allocation5], 768  }
 0x382   :  { %531 = vsyncadd [#allocation5], 4294966528 }
 0x383   :  { %403 = vsyncpa [#allocation4], 1 }
 0x384   :  { %404 = vsyncpa [#allocation11], 1 }
 0x385   :  { %405 = vsyncpa [#allocation5], 1 }
 0x386   :  { %406 = vsyncpa [#allocation6], 1 }
 0x387   :  { %407 = vsyncpa [#allocation8], 1 }

</bundles_post_ra>
